<compile_context>
chip_gen: v6e
topology: v6e:2x2x1
jax: 0.10.0
libtpu: 0.0.40
codegen_flags: <defaults>
</compile_context>

<pallas_src>
import jax
import jax.numpy as jnp
from jax.experimental import pallas as pl
from jax.experimental.pallas import tpu as pltpu

EPS = 1e-5
D_NODE = 32
D_PAIR = 16
C_HID = 32
N_HEAD = 8


# --------------------------------------------------------------------------
# small helpers
# --------------------------------------------------------------------------
def _layernorm(x, w, b):
    mu = jnp.mean(x, axis=-1, keepdims=True)
    var = jnp.mean((x - mu) ** 2, axis=-1, keepdims=True)
    return (x - mu) * jax.lax.rsqrt(var + EPS) * w + b


def _rep_spec(arr):
    nd = arr.ndim
    return pl.BlockSpec(arr.shape, lambda i, j, _nd=nd: (0,) * _nd)


def _tpu_vmem_capacity():
    try:
        cap = pltpu.get_tpu_info().vmem_capacity_bytes
        if cap:
            return int(cap)
    except Exception:
        pass
    return None


def _vmem_limit_bytes():
    cap = _tpu_vmem_capacity()
    if cap is None:
        return 48 * 1024 * 1024  # safe everywhere (v7x has only 64 MiB/TC)
    return int(min(cap * 3 // 4, 112 * 1024 * 1024))


def _target_rows():
    cap = _tpu_vmem_capacity()
    if cap is not None and cap >= 96 * 1024 * 1024:
        return 512  # v5e / v6e: 128 MiB VMEM -> bigger tiles
    return 256      # v7x (64 MiB) or unknown


def _num_tensorcores():
    try:
        info = pltpu.get_tpu_info()
        for attr in ("num_cores", "core_count", "num_tensorcores",
                     "tensorcore_count"):
            v = getattr(info, attr, None)
            if v:
                return int(v)
    except Exception:
        pass
    return 1


def _largest_divisor_leq(n, target):
    t = max(1, min(n, target))
    while n % t:
        t -= 1
    return t


def _choose_group_tile(B, G, T, *, multi_core, target_rows,
                       logits_budget_bytes=8 * 1024 * 1024):
    """Tile of the batched ('grouped') axis; attention length is T."""
    per_row = T * T * 6  # one head's f32 logits + bf16 probs per grouped row
    cap = max(1, min(target_rows // max(T, 1),
                     logits_budget_bytes // max(per_row, 1)))
    tile = _largest_divisor_leq(G, cap)
    if multi_core:
        while tile > 1 and B * (G // tile) < 2:
            tile = _largest_divisor_leq(G, tile - 1)
    return tile


def _choose_pair_tile(B, Rq, Rk, *, multi_core, target=32):
    """Row tile for pair bias: divides Rq and keeps tile*Rk a multiple of 128."""
    cand = sorted({t for t in range(8, Rq + 1, 8)
                   if Rq % t == 0 and (t * Rk) % 128 == 0} | {Rq})
    ok = [t for t in cand if t <= target] or [cand[0]]
    tile = max(ok)
    if multi_core:
        while B * (Rq // tile) < 2:
            smaller = [t for t in cand if t < tile]
            if not smaller:
                break
            tile = max(smaller)
    return tile


# --------------------------------------------------------------------------
# Pair-bias kernel:  bias[b, h, i, k] = (LayerNorm(Z[b, i, k, :]) @ W_b)[h]
# One matmul per grid step, lane-dense bf16 store into a [B, H, Rq*Rk] slab.
# --------------------------------------------------------------------------
def _pair_bias_kernel(z_ref, lnw_ref, lnb_ref, wb_ref, o_ref):
    _, tile_r, Rk, dp = z_ref.shape
    z = z_ref[0].astype(jnp.float32)                          # (tile_r, Rk, dp)
    zn = _layernorm(z, lnw_ref[...], lnb_ref[...])
    zn2 = zn.reshape(tile_r * Rk, dp)
    wb = wb_ref[...].astype(jnp.float32)                      # (dp, H)
    # b[h, r*Rk + k] = sum_d wb[d, h] * zn[r, k, d]  -- one MXU pass,
    # output last dim is a multiple of 128 -> unmasked vst.
    b = jax.lax.dot_general(wb, zn2, (((0,), (1,)), ((), ())),
                            preferred_element_type=jnp.float32)  # (H, tile_r*Rk)
    o_ref[0] = b.astype(o_ref.dtype)


def pair_bias(pair, ln_w, ln_b, w_b, *, n_head, multi_core, vmem_limit):
    B, Rq, Rk, dp = pair.shape
    tile_r = _choose_pair_tile(B, Rq, Rk, multi_core=multi_core)
    flat = pl.pallas_call(
        _pair_bias_kernel,
        out_shape=jax.ShapeDtypeStruct((B, n_head, Rq * Rk), jnp.bfloat16),
        grid=(B, Rq // tile_r),
        in_specs=[pl.BlockSpec((1, tile_r, Rk, dp), lambda i, j: (i, j, 0, 0)),
                  _rep_spec(ln_w), _rep_spec(ln_b), _rep_spec(w_b)],
        out_specs=pl.BlockSpec((1, n_head, tile_r * Rk), lambda i, j: (i, 0, j)),
        compiler_params=pltpu.CompilerParams(
            dimension_semantics=("parallel", "parallel"),
            vmem_limit_bytes=vmem_limit),
    )(pair, ln_w, ln_b, w_b)
    # contiguous row-major split of the last axis: free metadata reshape in XLA
    return flat.reshape(B, n_head, Rq, Rk)


# --------------------------------------------------------------------------
# Gated self-attention (+ optional fused transition):
#   LN -> fused QKV/gate matmul -> per-head bias/mask softmax -> gate ->
#   single output projection -> residual [-> LN -> W1 -> relu -> W2 -> residual]
# x block: (1, TILE_G, T, D); attention over T, batched over TILE_G.
# --------------------------------------------------------------------------
def _make_attn_kernel(H, C, *, has_bias, fuse_transition):
    HC = H * C

    def kernel(*refs):
        if has_bias:
            x_ref, m_ref, b_ref = refs[:3]
            rest = refs[3:]
        else:
            x_ref, m_ref = refs[:2]
            b_ref = None
            rest = refs[2:]
        if fuse_transition:
            (lnw, lnb, wf, bg, wo, bo,
             lnt_w, lnt_b, w1, b1, w2, b2, o_ref) = rest
        else:
            lnw, lnb, wf, bg, wo, bo, o_ref = rest

        x = x_ref[0].astype(jnp.float32)                      # (A, T, D)
        A, T, D = x.shape
        x2 = x.reshape(A * T, D)
        xn = _layernorm(x2, lnw[...], lnb[...])

        # fused QKV + gate projection: one K=D matmul, bf16 operands, f32 acc.
        # 1/sqrt(c) is pre-folded into the Q columns of wf in the wrapper.
        fused = jnp.dot(xn.astype(jnp.bfloat16), wf[...],
                        preferred_element_type=jnp.float32)   # (A*T, 4*HC)
        gate = jax.nn.sigmoid(fused[:, 3 * HC:] + bg[...])    # (A*T, HC) f32
        qkv = fused[:, :3 * HC].astype(jnp.bfloat16).reshape(A, T, 3 * HC)

        mask_bias = 1e9 * (m_ref[0].astype(jnp.float32) - 1.0)  # (A, 1, T)

        ctx = []
        for h in range(H):
            q = qkv[:, :, h * C:(h + 1) * C]
            k = qkv[:, :, HC + h * C:HC + (h + 1) * C]
            v = qkv[:, :, 2 * HC + h * C:2 * HC + (h + 1) * C]
            logits = jax.lax.dot_general(
                q, k, (((2,), (2,)), ((0,), (0,))),
                preferred_element_type=jnp.float32)            # (A, T, T)
            if has_bias:
                logits = logits + b_ref[0, h].astype(jnp.float32)
            logits = logits + mask_bias
            mmax = jnp.max(logits, axis=-1, keepdims=True)
            p = jnp.exp(logits - mmax)
            p = p * pl.reciprocal(jnp.sum(p, axis=-1, keepdims=True),
                                  approx=True)
            ctx.append(jax.lax.dot_general(
                p.astype(jnp.bfloat16), v, (((2,), (1,)), ((0,), (0,))),
                preferred_element_type=jnp.float32))           # (A, T, C)

        wa = jnp.concatenate(ctx, axis=-1).reshape(A * T, HC)  # f32
        # single K=HC output projection, gate applied once
        proj = jnp.dot((wa * gate).astype(jnp.bfloat16), wo[...],
                       preferred_element_type=jnp.float32) + bo[...]
        out = x2 + proj                                        # attention residual

        if fuse_transition:
            # MSATransition fused: y = x + W2 @ relu(W1 @ LN(x))
            tn = _layernorm(out, lnt_w[...], lnt_b[...])
            h1 = jnp.maximum(
                jnp.dot(tn.astype(jnp.bfloat16), w1[...],
                        preferred_element_type=jnp.float32) + b1[...], 0.0)
            out = out + jnp.dot(h1.astype(jnp.bfloat16), w2[...],
                                preferred_element_type=jnp.float32) + b2[...]

        o_ref[0] = out.reshape(A, T, D).astype(o_ref.dtype)

    return kernel


def gated_self_attention(x, mask, bias, attn_params, *, c, n_head, tile_g,
                         vmem_limit, trans_params=None):
    B, G, T, D = x.shape
    H = n_head
    mask4 = mask.reshape(B, G, 1, T).astype(jnp.float32)
    has_bias = bias is not None
    fuse_transition = trans_params is not None
    kernel = _make_attn_kernel(H, c, has_bias=has_bias,
                               fuse_transition=fuse_transition)

    inputs = [x, mask4]
    in_specs = [pl.BlockSpec((1, tile_g, T, D), lambda i, j: (i, j, 0, 0)),
                pl.BlockSpec((1, tile_g, 1, T), lambda i, j: (i, j, 0, 0))]
    if has_bias:
        inputs.append(bias)
        # constant over the j axis -> the pipeline skips re-fetching it.
        # TODO(synk): on v7x single-buffer this block (pl.Buffered(1)) once
        # 1-deep pipelining is confirmed supported by the installed jax.
        in_specs.append(pl.BlockSpec((1, H, T, T), lambda i, j: (i, 0, 0, 0)))
    weights = list(attn_params) + (list(trans_params) if fuse_transition else [])
    for w in weights:
        inputs.append(w)
        in_specs.append(_rep_spec(w))

    return pl.pallas_call(
        kernel,
        out_shape=jax.ShapeDtypeStruct(x.shape, x.dtype),
        grid=(B, G // tile_g),
        in_specs=in_specs,
        out_specs=pl.BlockSpec((1, tile_g, T, D), lambda i, j: (i, j, 0, 0)),
        compiler_params=pltpu.CompilerParams(
            dimension_semantics=("parallel", "parallel"),
            vmem_limit_bytes=vmem_limit),
    )(*inputs)


# --------------------------------------------------------------------------
# MSACore forward (Pallas)
# --------------------------------------------------------------------------
def msa_core_forward(node, pair, node_mask, p):
    B, S, L, D = node.shape
    HC = N_HEAD * C_HID
    q_scale = C_HID ** -0.5
    multi_core = _num_tensorcores() > 1
    vmem_limit = _vmem_limit_bytes()
    target_rows = _target_rows()

    # scatter(node_mask), gather_async, row_to_col: identity for 1 device.
    # dropout: eval mode -> identity.

    # --- pair bias, emitted directly in bf16 and [B, H, L, L] layout ---
    bias = pair_bias(pair, p['ln_z_w'], p['ln_z_b'], p['w_b'],
                     n_head=N_HEAD, multi_core=multi_core,
                     vmem_limit=vmem_limit)

    # --- MSARowAttentionWithPairBias (residual + out_bias fused in-kernel) ---
    wf_row = jnp.concatenate(
        [p['wqkv_row'][:, :HC] * q_scale,      # fold 1/sqrt(c) into Q columns
         p['wqkv_row'][:, HC:], p['wg_row']], axis=1).astype(jnp.bfloat16)
    row_params = (p['ln_m_w'], p['ln_m_b'], wf_row, p['bg_row'],
                  p['wo_row'].astype(jnp.bfloat16), p['out_bias_row'])
    node = gated_self_attention(
        node, node_mask, bias, row_params, c=C_HID, n_head=N_HEAD,
        tile_g=_choose_group_tile(B, S, L, multi_core=multi_core,
                                  target_rows=target_rows),
        vmem_limit=vmem_limit)

    # --- MSAColumnAttention + MSATransition (fused into one kernel) ---
    # TODO(synk): the [B,S,L,D]<->[B,L,S,D] relayout is still an XLA swapaxes
    # (2 HBM passes of node); removing it needs in-kernel major-dim transpose
    # or non-leading dot_general batch dims, which Mosaic does not lower today.
    wf_col = jnp.concatenate(
        [p['wqkv_col'][:, :HC] * q_scale,
         p['wqkv_col'][:, HC:], p['wg_col']], axis=1).astype(jnp.bfloat16)
    col_params = (p['ln_mc_w'], p['ln_mc_b'], wf_col, p['bg_col'],
                  p['wo_col'].astype(jnp.bfloat16), p['bo_col'])
    trans_params = (p['ln_t_w'], p['ln_t_b'],
                    p['w1'].astype(jnp.bfloat16), p['b1'],
                    p['w2'].astype(jnp.bfloat16), p['b2'])
    nodeT = jnp.swapaxes(node, 1, 2)
    maskT = jnp.swapaxes(node_mask, 1, 2)
    nodeT = gated_self_attention(
        nodeT, maskT, None, col_params, c=C_HID, n_head=N_HEAD,
        tile_g=_choose_group_tile(B, L, S, multi_core=multi_core,
                                  target_rows=target_rows),
        vmem_limit=vmem_limit, trans_params=trans_params)
    return jnp.swapaxes(nodeT, 1, 2)


# --------------------------------------------------------------------------
# Pure-JAX reference (fp32, for correctness check)
# --------------------------------------------------------------------------
def _ref_layernorm(x, w, b):
    mu = x.mean(-1, keepdims=True)
    var = ((x - mu) ** 2).mean(-1, keepdims=True)
    return (x - mu) * jax.lax.rsqrt(var + EPS) * w[0] + b[0]


def _ref_attention(x, mask, bias, params, c, H):
    lnw, lnb, wqkv, wg, bg, wo, bo = params
    B, S, L, D = x.shape
    HC = H * c
    xn = _ref_layernorm(x, lnw, lnb)
    qkv = xn @ wqkv
    q, k, v = qkv[..., :HC], qkv[..., HC:2 * HC], qkv[..., 2 * HC:]

    def heads(t):
        return t.reshape(B, S, L, H, c).transpose(0, 1, 3, 2, 4)

    q = heads(q) * (c ** -0.5)
    k = heads(k)
    v = heads(v)
    logits = jnp.einsum('bshqc,bshkc->bshqk', q, k)
    if bias is not None:
        logits = logits + bias[:, None]
    logits = logits + (1e9 * (mask - 1.0))[:, :, None, None, :]
    w = jax.nn.softmax(logits, axis=-1)
    wa = jnp.einsum('bshqk,bshkc->bshqc', w, v)
    wa = wa.transpose(0, 1, 3, 2, 4).reshape(B, S, L, HC)
    gate = jax.nn.sigmoid(xn @ wg + bg[0])
    out = (wa * gate) @ wo + bo[0]
    return x + out


def _ref_transition(x, params):
    lnw, lnb, w1, b1, w2, b2 = params
    xn = _ref_layernorm(x, lnw, lnb)
    h = jnp.maximum(xn @ w1 + b1[0], 0.0)
    return x + (h @ w2 + b2[0])


def msa_core_reference(node, pair, node_mask, p):
    zb = _ref_layernorm(pair, p['ln_z_w'], p['ln_z_b']) @ p['w_b']
    bias = jnp.transpose(zb, (0, 3, 1, 2))
    row_params = (p['ln_m_w'], p['ln_m_b'], p['wqkv_row'], p['wg_row'],
                  p['bg_row'], p['wo_row'], p['out_bias_row'])
    node = _ref_attention(node, node_mask, bias, row_params, C_HID, N_HEAD)
    col_params = (p['ln_mc_w'], p['ln_mc_b'], p['wqkv_col'], p['wg_col'],
                  p['bg_col'], p['wo_col'], p['bo_col'])
    nodeT = jnp.swapaxes(node, 1, 2)
    maskT = jnp.swapaxes(node_mask, 1, 2)
    nodeT = _ref_attention(nodeT, maskT, None, col_params, C_HID, N_HEAD)
    node = jnp.swapaxes(nodeT, 1, 2)
    trans_params = (p['ln_t_w'], p['ln_t_b'], p['w1'], p['b1'], p['w2'], p['b2'])
    return _ref_transition(node, trans_params)


# --------------------------------------------------------------------------
# Deterministic parameter init (synthetic weights; no checkpoint load)
# --------------------------------------------------------------------------
def init_params(key):
    HC = N_HEAD * C_HID
    shapes = {
        'ln_m_w': (1, D_NODE), 'ln_m_b': (1, D_NODE),
        'wqkv_row': (D_NODE, 3 * HC), 'wg_row': (D_NODE, HC), 'bg_row': (1, HC),
        'wo_row': (HC, D_NODE), 'out_bias_row': (1, D_NODE),
        'ln_z_w': (1, D_PAIR), 'ln_z_b': (1, D_PAIR), 'w_b': (D_PAIR, N_HEAD),
        'ln_mc_w': (1, D_NODE), 'ln_mc_b': (1, D_NODE),
        'wqkv_col': (D_NODE, 3 * HC), 'wg_col': (D_NODE, HC), 'bg_col': (1, HC),
        'wo_col': (HC, D_NODE), 'bo_col': (1, D_NODE),
        'ln_t_w': (1, D_NODE), 'ln_t_b': (1, D_NODE),
        'w1': (D_NODE, 4 * D_NODE), 'b1': (1, 4 * D_NODE),
        'w2': (4 * D_NODE, D_NODE), 'b2': (1, D_NODE),
    }
    keys = jax.random.split(key, len(shapes))
    params = {}
    for (name, shp), k in zip(shapes.items(), keys):
        params[name] = (0.15 * jax.random.normal(k, shp)).astype(jnp.float32)
    # layernorm scales / gating bias centered at 1 (like the PyTorch module)
    for name in ('ln_m_w', 'ln_z_w', 'ln_mc_w', 'ln_t_w', 'bg_row', 'bg_col'):
        params[name] = params[name] + 1.0
    return params


if __name__ == "__main__":
    B, N_SEQ, N_RES = 1, 8, 16
    kn, kp, km = jax.random.split(jax.random.PRNGKey(0), 3)
    node = jax.random.normal(kn, (B, N_SEQ, N_RES, D_NODE), jnp.float32)
    pair = jax.random.normal(kp, (B, N_RES, N_RES, D_PAIR), jnp.float32)
    node_mask = (jax.random.uniform(km, (B, N_SEQ, N_RES)) > 0.2).astype(jnp.float32)
    params = init_params(jax.random.PRNGKey(42))

    out = jax.block_until_ready(msa_core_forward(node, pair, node_mask, params))
    ref = jax.block_until_ready(msa_core_reference(node, pair, node_mask, params))

    assert out.shape == node.shape and out.dtype == node.dtype
    # kernel runs matmuls in bf16 (fp32 accumulation); reference is pure fp32
    if not bool(jnp.allclose(out, ref, atol=8e-2, rtol=8e-2)):
        raise SystemExit("mismatch: max abs err = %g"
                         % float(jnp.max(jnp.abs(out - ref))))
    print("KERNEL_OK")
</pallas_src>

<mosaic_0001>
module attributes {stable_mosaic.version = 11 : i64} {
  func.func @_pair_bias_kernel(%arg0: i32, %arg1: i32, %arg2: memref<1x16x16x16xf32, #tpu.memory_space<vmem>>, %arg3: memref<1x16xf32, #tpu.memory_space<vmem>>, %arg4: memref<1x16xf32, #tpu.memory_space<vmem>>, %arg5: memref<16x8xf32, #tpu.memory_space<vmem>>, %arg6: memref<1x8x256xbf16, #tpu.memory_space<vmem>>) attributes {dimension_semantics = [#tpu.dimension_semantics<parallel>, #tpu.dimension_semantics<parallel>], iteration_bounds = array<i64: 1, 1>, scalar_prefetch = 0 : i64, scratch_operands = 0 : i64, tpu.core_type = #tpu.core_type<tc>, window_params = [{transform_indices = @transform_0, window_bounds = array<i64: 1, 16, 16, 16>}, {pipeline_mode = #tpu.pipeline_mode<synchronous>, transform_indices = @transform_1, window_bounds = array<i64: 1, 16>}, {pipeline_mode = #tpu.pipeline_mode<synchronous>, transform_indices = @transform_2, window_bounds = array<i64: 1, 16>}, {pipeline_mode = #tpu.pipeline_mode<synchronous>, transform_indices = @transform_3, window_bounds = array<i64: 16, 8>}, {transform_indices = @transform_4, window_bounds = array<i64: 1, 8, 256>}]} {
    %c0 = arith.constant 0 : index
    %c0_0 = arith.constant 0 : index
    %c0_1 = arith.constant 0 : index
    %c0_2 = arith.constant 0 : index
    %0 = vector.load %arg2[%c0, %c0_0, %c0_1, %c0_2] : memref<1x16x16x16xf32, #tpu.memory_space<vmem>>, vector<1x16x16x16xf32>
    %1 = vector.shape_cast %0 : vector<1x16x16x16xf32> to vector<16x16x16xf32>
    %c0_3 = arith.constant 0 : index
    %c0_4 = arith.constant 0 : index
    %2 = vector.load %arg3[%c0_3, %c0_4] : memref<1x16xf32, #tpu.memory_space<vmem>>, vector<1x16xf32>
    %c0_5 = arith.constant 0 : index
    %c0_6 = arith.constant 0 : index
    %3 = vector.load %arg4[%c0_5, %c0_6] : memref<1x16xf32, #tpu.memory_space<vmem>>, vector<1x16xf32>
    %cst = arith.constant dense<0.000000e+00> : vector<16x16xf32>
    %4 = vector.multi_reduction <add>, %1, %cst [2] : vector<16x16x16xf32> to vector<16x16xf32>
    %5 = vector.shape_cast %4 : vector<16x16xf32> to vector<16x16x1xf32>
    %cst_7 = arith.constant 1.600000e+01 : f32
    %6 = vector.broadcast %cst_7 : f32 to vector<16x16x1xf32>
    %7 = arith.divf %5, %6 : vector<16x16x1xf32>
    %8 = vector.broadcast %7 : vector<16x16x1xf32> to vector<16x16x16xf32>
    %9 = arith.subf %1, %8 : vector<16x16x16xf32>
    %10 = arith.mulf %9, %9 : vector<16x16x16xf32>
    %cst_8 = arith.constant dense<0.000000e+00> : vector<16x16xf32>
    %11 = vector.multi_reduction <add>, %10, %cst_8 [2] : vector<16x16x16xf32> to vector<16x16xf32>
    %12 = vector.shape_cast %11 : vector<16x16xf32> to vector<16x16x1xf32>
    %cst_9 = arith.constant 1.600000e+01 : f32
    %13 = vector.broadcast %cst_9 : f32 to vector<16x16x1xf32>
    %14 = arith.divf %12, %13 : vector<16x16x1xf32>
    %15 = vector.broadcast %7 : vector<16x16x1xf32> to vector<16x16x16xf32>
    %16 = arith.subf %1, %15 : vector<16x16x16xf32>
    %cst_10 = arith.constant 9.99999974E-6 : f32
    %17 = vector.broadcast %cst_10 : f32 to vector<16x16x1xf32>
    %18 = arith.addf %14, %17 : vector<16x16x1xf32>
    %19 = math.rsqrt %18 : vector<16x16x1xf32>
    %20 = vector.broadcast %19 : vector<16x16x1xf32> to vector<16x16x16xf32>
    %21 = arith.mulf %16, %20 : vector<16x16x16xf32>
    %22 = vector.shape_cast %2 : vector<1x16xf32> to vector<1x1x16xf32>
    %23 = vector.broadcast %22 : vector<1x1x16xf32> to vector<16x16x16xf32>
    %24 = arith.mulf %21, %23 : vector<16x16x16xf32>
    %25 = vector.shape_cast %3 : vector<1x16xf32> to vector<1x1x16xf32>
    %26 = vector.broadcast %25 : vector<1x1x16xf32> to vector<16x16x16xf32>
    %27 = arith.addf %24, %26 : vector<16x16x16xf32>
    %28 = vector.shape_cast %27 : vector<16x16x16xf32> to vector<256x16xf32>
    %c0_11 = arith.constant 0 : index
    %c0_12 = arith.constant 0 : index
    %29 = vector.load %arg5[%c0_11, %c0_12] : memref<16x8xf32, #tpu.memory_space<vmem>>, vector<16x8xf32>
    %cst_13 = arith.constant dense<0.000000e+00> : vector<8x256xf32>
    %30 = tpu.matmul %29, %28, %cst_13 {dimension_numbers = #tpu.dot_dimension_numbers<[0], [1], [1], [0], [0, 1, 1, 0], [], []>} : vector<16x8xf32>, vector<256x16xf32>, vector<8x256xf32> -> vector<8x256xf32>
    %31 = arith.truncf %30 : vector<8x256xf32> to vector<8x256xbf16>
    %c0_14 = arith.constant 0 : index
    %c0_15 = arith.constant 0 : index
    %c0_16 = arith.constant 0 : index
    %32 = vector.load %arg6[%c0_14, %c0_15, %c0_16] : memref<1x8x256xbf16, #tpu.memory_space<vmem>>, vector<1x8x256xbf16>
    %33 = vector.shape_cast %32 : vector<1x8x256xbf16> to vector<8x256xbf16>
    %34 = vector.shape_cast %31 : vector<8x256xbf16> to vector<1x8x256xbf16>
    tpu.vector_store %arg6[%c0_14, %c0_15, %c0_16], %34 {strides = array<i32>} : memref<1x8x256xbf16, #tpu.memory_space<vmem>>, vector<1x8x256xbf16>,
    return
  }
  func.func @transform_0(%arg0: i32, %arg1: i32) -> (i32, i32, i32, i32) {
    %c0_i32 = arith.constant 0 : i32
    %c0_i32_0 = arith.constant 0 : i32
    %c0_i32_1 = arith.constant 0 : i32
    return %arg0, %arg1, %c0_i32, %c0_i32_0 : i32, i32, i32, i32
  }
  func.func @transform_1(%arg0: i32, %arg1: i32) -> (i32, i32) {
    %c0_i32 = arith.constant 0 : i32
    %c0_i32_0 = arith.constant 0 : i32
    %c0_i32_1 = arith.constant 0 : i32
    return %c0_i32, %c0_i32_0 : i32, i32
  }
  func.func @transform_2(%arg0: i32, %arg1: i32) -> (i32, i32) {
    %c0_i32 = arith.constant 0 : i32
    %c0_i32_0 = arith.constant 0 : i32
    %c0_i32_1 = arith.constant 0 : i32
    return %c0_i32, %c0_i32_0 : i32, i32
  }
  func.func @transform_3(%arg0: i32, %arg1: i32) -> (i32, i32) {
    %c0_i32 = arith.constant 0 : i32
    %c0_i32_0 = arith.constant 0 : i32
    %c0_i32_1 = arith.constant 0 : i32
    return %c0_i32, %c0_i32_0 : i32, i32
  }
  func.func @transform_4(%arg0: i32, %arg1: i32) -> (i32, i32, i32) {
    %c0_i32 = arith.constant 0 : i32
    %c0_i32_0 = arith.constant 0 : i32
    return %arg0, %c0_i32, %arg1 : i32, i32, i32
  }
}

</mosaic_0001>

<bundles_post_ra>
// kernel: tpu_custom_call.1
= control target key start
LH: loop header
LB: loop body
LE: loop exit
PB: predicated region body
PF: predicated region fallthrough
CT: control target
= control target key end

     0   :  { %9 = vsyncpa [#allocation3], 0  ;;  %s1473_s0 = inlined_call_operand.hbm [shape: f32[1,16,16,16], index: 0, kind: input, shape index: {}]   ;;  %s1474_s1 = inlined_call_operand.vmem [shape: f32[1,16], index: 1, kind: input, shape index: {}]   ;;  %s1475_s2 = inlined_call_operand.vmem [shape: f32[1,16], index: 2, kind: input, shape index: {}]   ;;  %s1476_s3 = inlined_call_operand.vmem [shape: f32[16,8], index: 3, kind: input, shape index: {}]   ;;  %s1477_s4 = inlined_call_operand.hbm [shape: bf16[1,8,256], index: 4, kind: output, shape index: {}]  }
   0x1   :  { %10 = vsyncpa [#allocation4], 0  ;;  %s972_s15 = smov [#allocation2]  }
   0x2   :  { %s16_s16 = sshll.u32 %s972_s15, 4  ;;  %s17_s16 = int_to_ptr.vmem [resolvable:$true] %s16_s16 }
   0x3   :  { %s936_s17 = scalar_lea.vmem %s17_s16, 4096  ;;  %p941_p1 = scmp.lt.s32.totalorder %s17_s16, %s17_s16 }
   0x4   :  { %p937_p0 = scmp.ne.s32.totalorder %s17_s16, %s936_s17  ;;  %p942_p2 = scmp.lt.s32.totalorder %s936_s17, %s936_s17 }
   0x6   :  { %p943_p3 = por %p942_p2, %p941_p1 }
   0x8   :  { %p944_p4 = pnand %p943_p3, %p937_p0 }
   0xa   :  { %947 = shalt.err (!%p944_p4)
}
   0xb   :  { %s973_s18 = smov 128   ;;  %s974_s19 = smov 8  }
   0xc   :  { %22 = dma.hbm_to_vmem [thread:$0]  %s1473_s0, 4096, %s17_s16, [#allocation3], %s973_s18, %s973_s18, %s974_s19  }
   0xd   :  { %968 = dma.done.wait [#allocation3], 4096  }
   0xe   :  { %969 = vsyncadd [#allocation3], 4294963200  ;;  %vm66_vm0 = vcmask 130048   ;;  %v1004_v0 = vld [vmem:[#allocation2 + $0xf8] sm:$0xff]  ;;  %v1006_v1 = vld [vmem:[#allocation2 + $0xf0] sm:$0xff] }
   0xf   :  { %v1008_v2 = vld [vmem:[#allocation2 + $0x78] sm:$0xff]  ;;  %v160_v3 = vsel %vm66_vm0, %v1004_v0, 0.0  ;;  %v157_v4 = vsel %vm66_vm0, %v1006_v1, 0.0  ;;  %v1014_v5 = vld [vmem:[#allocation2 + $0x70] sm:$0xff]  ;;  %v1020_v8 = vld [vmem:[#allocation2 + $0xe8] sm:$0xff] }
  0x10   :  { %161 = vadd.xlane.f32.xlu0 %v160_v3  ;;  %158 = vadd.xlane.f32.xlu1 %v157_v4  ;;  %v112_v6 = vsel %vm66_vm0, %v1008_v2, 0.0  ;;  %v109_v7 = vsel %vm66_vm0, %v1014_v5, 0.0  ;;  %v1022_v9 = vld [vmem:[#allocation2 + $0x68] sm:$0xff]  ;;  %v154_v10 = vsel %vm66_vm0, %v1020_v8, 0.0  ;;  %v1028_v12 = vld [vmem:[#allocation2 + $0xe0] sm:$0xff]  ;;  %v1036_v16 = vld [vmem:[#allocation2 + $0xd8] sm:$0xff] }
  0x11   :  { %v106_v11 = vsel %vm66_vm0, %v1022_v9, 0.0  ;;  %v1030_v13 = vld [vmem:[#allocation2 + $0x60] sm:$0xff]  ;;  %v151_v14 = vsel %vm66_vm0, %v1028_v12, 0.0  ;;  %v1038_v17 = vld [vmem:[#allocation2 + $0x58] sm:$0xff]  ;;  %v148_v18 = vsel %vm66_vm0, %v1036_v16, 0.0  ;;  %v1044_v20 = vld [vmem:[#allocation2 + $0xd0] sm:$0xff] }
  0x12   :  { %v103_v15 = vsel %vm66_vm0, %v1030_v13, 0.0  ;;  %v100_v19 = vsel %vm66_vm0, %v1038_v17, 0.0  ;;  %v1046_v21 = vld [vmem:[#allocation2 + $0x50] sm:$0xff]  ;;  %v145_v22 = vsel %vm66_vm0, %v1044_v20, 0.0  ;;  %v1052_v24 = vld [vmem:[#allocation2 + $0xc8] sm:$0xff]  ;;  %v1060_v28 = vld [vmem:[#allocation2 + $0xc0] sm:$0xff] }
  0x13   :  { %v97_v23 = vsel %vm66_vm0, %v1046_v21, 0.0  ;;  %v1054_v25 = vld [vmem:[#allocation2 + $0x48] sm:$0xff]  ;;  %v142_v26 = vsel %vm66_vm0, %v1052_v24, 0.0  ;;  %v1062_v29 = vld [vmem:[#allocation2 + $0x40] sm:$0xff]  ;;  %v139_v30 = vsel %vm66_vm0, %v1060_v28, 0.0  ;;  %v1068_v32 = vld [vmem:[#allocation2 + $0xb8] sm:$0xff] }
  0x14   :  { %113 = vadd.xlane.f32.xlu0 %v112_v6  ;;  %110 = vadd.xlane.f32.xlu1 %v109_v7  ;;  %v94_v27 = vsel %vm66_vm0, %v1054_v25, 0.0  ;;  %v91_v31 = vsel %vm66_vm0, %v1062_v29, 0.0  ;;  %v1070_v33 = vld [vmem:[#allocation2 + $0x38] sm:$0xff]  ;;  %v136_v34 = vsel %vm66_vm0, %v1068_v32, 0.0  ;;  %v1076_v36 = vld [vmem:[#allocation2 + $0xb0] sm:$0xff]  ;;  %v1084_v40 = vld [vmem:[#allocation2 + $0xa8] sm:$0xff] }
  0x15   :  { %v88_v35 = vsel %vm66_vm0, %v1070_v33, 0.0  ;;  %v1078_v37 = vld [vmem:[#allocation2 + $0x30] sm:$0xff]  ;;  %v133_v38 = vsel %vm66_vm0, %v1076_v36, 0.0  ;;  %v1086_v41 = vld [vmem:[#allocation2 + $0x28] sm:$0xff]  ;;  %v130_v42 = vsel %vm66_vm0, %v1084_v40, 0.0  ;;  %v1092_v44 = vld [vmem:[#allocation2 + $0xa0] sm:$0xff] }
  0x16   :  { %v85_v39 = vsel %vm66_vm0, %v1078_v37, 0.0  ;;  %v82_v43 = vsel %vm66_vm0, %v1086_v41, 0.0  ;;  %v1094_v45 = vld [vmem:[#allocation2 + $0x20] sm:$0xff]  ;;  %v127_v46 = vsel %vm66_vm0, %v1092_v44, 0.0  ;;  %v1100_v48 = vld [vmem:[#allocation2 + $0x98] sm:$0xff]  ;;  %v1108_v52 = vld [vmem:[#allocation2 + $0x90] sm:$0xff] }
  0x17   :  { %v79_v47 = vsel %vm66_vm0, %v1094_v45, 0.0  ;;  %v1102_v49 = vld [vmem:[#allocation2 + $0x18] sm:$0xff]  ;;  %v124_v50 = vsel %vm66_vm0, %v1100_v48, 0.0  ;;  %v1110_v53 = vld [vmem:[#allocation2 + $0x10] sm:$0xff]  ;;  %v121_v54 = vsel %vm66_vm0, %v1108_v52, 0.0  ;;  %v1116_v56 = vld [vmem:[#allocation2 + $0x88] sm:$0xff] }
  0x18   :  { %155 = vadd.xlane.f32.xlu0 %v154_v10  ;;  %107 = vadd.xlane.f32.xlu1 %v106_v11  ;;  %v76_v51 = vsel %vm66_vm0, %v1102_v49, 0.0  ;;  %v73_v55 = vsel %vm66_vm0, %v1110_v53, 0.0  ;;  %v1118_v57 = vld [vmem:[#allocation2 + $0x8] sm:$0xff]  ;;  %v118_v58 = vsel %vm66_vm0, %v1116_v56, 0.0  ;;  %v1124_v60 = vld [vmem:[#allocation2 + $0x80] sm:$0xff] }
  0x19   :  { %v70_v59 = vsel %vm66_vm0, %v1118_v57, 0.0  ;;  %v1126_v61 = vld [vmem:[#allocation2] sm:$0xff]  ;;  %v115_v62 = vsel %vm66_vm0, %v1124_v60, 0.0 }
  0x1a   :  { %v67_v63 = vsel %vm66_vm0, %v1126_v61, 0.0 }
  0x1c   :  { %152 = vadd.xlane.f32.xlu0 %v151_v14  ;;  %104 = vadd.xlane.f32.xlu1 %v103_v15 }
  0x20   :  { %149 = vadd.xlane.f32.xlu0 %v148_v18  ;;  %101 = vadd.xlane.f32.xlu1 %v100_v19 }
  0x24   :  { %146 = vadd.xlane.f32.xlu0 %v145_v22  ;;  %98 = vadd.xlane.f32.xlu1 %v97_v23 }
  0x28   :  { %143 = vadd.xlane.f32.xlu0 %v142_v26  ;;  %95 = vadd.xlane.f32.xlu1 %v94_v27 }
  0x2c   :  { %140 = vadd.xlane.f32.xlu0 %v139_v30  ;;  %92 = vadd.xlane.f32.xlu1 %v91_v31 }
  0x30   :  { %137 = vadd.xlane.f32.xlu0 %v136_v34  ;;  %89 = vadd.xlane.f32.xlu1 %v88_v35 }
  0x34   :  { %134 = vadd.xlane.f32.xlu0 %v133_v38  ;;  %86 = vadd.xlane.f32.xlu1 %v85_v39 }
  0x38   :  { %131 = vadd.xlane.f32.xlu0 %v130_v42  ;;  %83 = vadd.xlane.f32.xlu1 %v82_v43 }
  0x3c   :  { %128 = vadd.xlane.f32.xlu0 %v127_v46  ;;  %80 = vadd.xlane.f32.xlu1 %v79_v47 }
  0x40   :  { %125 = vadd.xlane.f32.xlu0 %v124_v50  ;;  %77 = vadd.xlane.f32.xlu1 %v76_v51 }
  0x44   :  { %122 = vadd.xlane.f32.xlu0 %v121_v54  ;;  %74 = vadd.xlane.f32.xlu1 %v73_v55 }
  0x48   :  { %119 = vadd.xlane.f32.xlu0 %v118_v58  ;;  %71 = vadd.xlane.f32.xlu1 %v70_v59 }
  0x4c   :  { %116 = vadd.xlane.f32.xlu0 %v115_v62  ;;  %68 = vadd.xlane.f32.xlu1 %v67_v63 }
  0x99   :  { %v162_v3 = vpop.xlane.xlu0 %161  ;;  %v159_v4 = vpop.xlane.xlu1 %158 }
  0x9a   :  { %v195_v6 = vmul.f32 0.0625, %v162_v3  ;;  %v194_v7 = vmul.f32 0.0625, %v159_v4 }
  0x9c   :  { %v1133_v10 = vsub.f32 %v1004_v0, %v195_v6  ;;  %v1136_v11 = vsub.f32 %v1006_v1, %v194_v7 }
  0x9d   :  { %v114_v14 = vpop.xlane.xlu0 %113  ;;  %v111_v15 = vpop.xlane.xlu1 %110 }
  0x9e   :  { %v179_v18 = vmul.f32 0.0625, %v114_v14  ;;  %v259_v19 = vmul.f32 %v1133_v10, %v1133_v10  ;;  %v178_v22 = vmul.f32 0.0625, %v111_v15  ;;  %v258_v23 = vmul.f32 %v1136_v11, %v1136_v11 }
  0xa0   :  { %v1143_v26 = vsub.f32 %v1008_v2, %v179_v18  ;;  %v353_v27 = vsel %vm66_vm0, %v259_v19, 0.0  ;;  %v1147_v0 = vsub.f32 %v1014_v5, %v178_v22  ;;  %v350_v30 = vsel %vm66_vm0, %v258_v23, 0.0 }
  0xa1   :  { %354 = vadd.xlane.f32.xlu0 %v353_v27  ;;  %v156_v1 = vpop.xlane.xlu0 %155  ;;  %v108_v31 = vpop.xlane.xlu1 %107 }
  0xa2   :  { %v193_v34 = vmul.f32 0.0625, %v156_v1  ;;  %v177_v35 = vmul.f32 0.0625, %v108_v31  ;;  %v243_v38 = vmul.f32 %v1143_v26, %v1143_v26  ;;  %v242_v39 = vmul.f32 %v1147_v0, %v1147_v0 }
  0xa4   :  { %v1155_v2 = vsub.f32 %v1020_v8, %v193_v34  ;;  %v1158_v42 = vsub.f32 %v1022_v9, %v177_v35  ;;  %v305_v5 = vsel %vm66_vm0, %v243_v38, 0.0  ;;  %v302_v47 = vsel %vm66_vm0, %v242_v39, 0.0 }
  0xa5   :  { %351 = vadd.xlane.f32.xlu0 %v350_v30  ;;  %v153_v43 = vpop.xlane.xlu0 %152  ;;  %306 = vadd.xlane.f32.xlu1 %v305_v5  ;;  %v105_v46 = vpop.xlane.xlu1 %104 }
  0xa6   :  { %v192_v50 = vmul.f32 0.0625, %v153_v43  ;;  %v257_v51 = vmul.f32 %v1155_v2, %v1155_v2  ;;  %v176_v54 = vmul.f32 0.0625, %v105_v46  ;;  %v241_v8 = vmul.f32 %v1158_v42, %v1158_v42 }
  0xa8   :  { %v1167_v55 = vsub.f32 %v1028_v12, %v192_v50  ;;  %v347_v9 = vsel %vm66_vm0, %v257_v51, 0.0  ;;  %v1171_v58 = vsub.f32 %v1030_v13, %v176_v54  ;;  %v299_v63 = vsel %vm66_vm0, %v241_v8, 0.0 }
  0xa9   :  { %348 = vadd.xlane.f32.xlu0 %v347_v9  ;;  %v150_v59 = vpop.xlane.xlu0 %149  ;;  %303 = vadd.xlane.f32.xlu1 %v302_v47  ;;  %v102_v62 = vpop.xlane.xlu1 %101 }
  0xaa   :  { %v191_v3 = vmul.f32 0.0625, %v150_v59  ;;  %v256_v4 = vmul.f32 %v1167_v55, %v1167_v55  ;;  %v175_v6 = vmul.f32 0.0625, %v102_v62  ;;  %v240_v12 = vmul.f32 %v1171_v58, %v1171_v58 }
  0xac   :  { %v1179_v7 = vsub.f32 %v1036_v16, %v191_v3  ;;  %v344_v13 = vsel %vm66_vm0, %v256_v4, 0.0  ;;  %v1183_v14 = vsub.f32 %v1038_v17, %v175_v6  ;;  %v296_v19 = vsel %vm66_vm0, %v240_v12, 0.0 }
  0xad   :  { %345 = vadd.xlane.f32.xlu0 %v344_v13  ;;  %v147_v15 = vpop.xlane.xlu0 %146  ;;  %300 = vadd.xlane.f32.xlu1 %v299_v63  ;;  %v99_v18 = vpop.xlane.xlu1 %98 }
  0xae   :  { %v190_v22 = vmul.f32 0.0625, %v147_v15  ;;  %v255_v23 = vmul.f32 %v1179_v7, %v1179_v7  ;;  %v174_v27 = vmul.f32 0.0625, %v99_v18  ;;  %v239_v16 = vmul.f32 %v1183_v14, %v1183_v14 }
  0xb0   :  { %v1191_v1 = vsub.f32 %v1044_v20, %v190_v22  ;;  %v341_v17 = vsel %vm66_vm0, %v255_v23, 0.0  ;;  %v1195_v30 = vsub.f32 %v1046_v21, %v174_v27  ;;  %v293_v35 = vsel %vm66_vm0, %v239_v16, 0.0 }
  0xb1   :  { %342 = vadd.xlane.f32.xlu0 %v341_v17  ;;  %v144_v31 = vpop.xlane.xlu0 %143  ;;  %297 = vadd.xlane.f32.xlu1 %v296_v19  ;;  %v96_v34 = vpop.xlane.xlu1 %95 }
  0xb2   :  { %v189_v38 = vmul.f32 0.0625, %v144_v31  ;;  %v254_v39 = vmul.f32 %v1191_v1, %v1191_v1  ;;  %v173_v5 = vmul.f32 0.0625, %v96_v34  ;;  %v238_v20 = vmul.f32 %v1195_v30, %v1195_v30 }
  0xb4   :  { %v1203_v43 = vsub.f32 %v1052_v24, %v189_v38  ;;  %v338_v21 = vsel %vm66_vm0, %v254_v39, 0.0  ;;  %v1207_v46 = vsub.f32 %v1054_v25, %v173_v5  ;;  %v290_v51 = vsel %vm66_vm0, %v238_v20, 0.0 }
  0xb5   :  { %339 = vadd.xlane.f32.xlu0 %v338_v21  ;;  %v141_v47 = vpop.xlane.xlu0 %140  ;;  %294 = vadd.xlane.f32.xlu1 %v293_v35  ;;  %v93_v50 = vpop.xlane.xlu1 %92 }
  0xb6   :  { %v188_v54 = vmul.f32 0.0625, %v141_v47  ;;  %v253_v8 = vmul.f32 %v1203_v43, %v1203_v43  ;;  %v172_v9 = vmul.f32 0.0625, %v93_v50  ;;  %v237_v24 = vmul.f32 %v1207_v46, %v1207_v46 }
  0xb8   :  { %v1215_v59 = vsub.f32 %v1060_v28, %v188_v54  ;;  %v335_v25 = vsel %vm66_vm0, %v253_v8, 0.0  ;;  %v1219_v62 = vsub.f32 %v1062_v29, %v172_v9  ;;  %v287_v4 = vsel %vm66_vm0, %v237_v24, 0.0 }
  0xb9   :  { %336 = vadd.xlane.f32.xlu0 %v335_v25  ;;  %v138_v63 = vpop.xlane.xlu0 %137  ;;  %291 = vadd.xlane.f32.xlu1 %v290_v51  ;;  %v90_v3 = vpop.xlane.xlu1 %89 }
  0xba   :  { %v187_v6 = vmul.f32 0.0625, %v138_v63  ;;  %v252_v12 = vmul.f32 %v1215_v59, %v1215_v59  ;;  %v171_v13 = vmul.f32 0.0625, %v90_v3  ;;  %v236_v28 = vmul.f32 %v1219_v62, %v1219_v62 }
  0xbc   :  { %v1227_v15 = vsub.f32 %v1068_v32, %v187_v6  ;;  %v332_v29 = vsel %vm66_vm0, %v252_v12, 0.0  ;;  %v1231_v18 = vsub.f32 %v1070_v33, %v171_v13  ;;  %v284_v23 = vsel %vm66_vm0, %v236_v28, 0.0 }
  0xbd   :  { %333 = vadd.xlane.f32.xlu0 %v332_v29  ;;  %v135_v19 = vpop.xlane.xlu0 %134  ;;  %288 = vadd.xlane.f32.xlu1 %v287_v4  ;;  %v87_v22 = vpop.xlane.xlu1 %86 }
  0xbe   :  { %v186_v27 = vmul.f32 0.0625, %v135_v19  ;;  %v251_v16 = vmul.f32 %v1227_v15, %v1227_v15  ;;  %v170_v17 = vmul.f32 0.0625, %v87_v22  ;;  %v235_v32 = vmul.f32 %v1231_v18, %v1231_v18 }
  0xc0   :  { %v1239_v31 = vsub.f32 %v1076_v36, %v186_v27  ;;  %v329_v33 = vsel %vm66_vm0, %v251_v16, 0.0  ;;  %v1243_v34 = vsub.f32 %v1078_v37, %v170_v17  ;;  %v281_v39 = vsel %vm66_vm0, %v235_v32, 0.0 }
  0xc1   :  { %330 = vadd.xlane.f32.xlu0 %v329_v33  ;;  %v132_v35 = vpop.xlane.xlu0 %131  ;;  %285 = vadd.xlane.f32.xlu1 %v284_v23  ;;  %v84_v38 = vpop.xlane.xlu1 %83 }
  0xc2   :  { %v185_v5 = vmul.f32 0.0625, %v132_v35  ;;  %v250_v20 = vmul.f32 %v1239_v31, %v1239_v31  ;;  %v169_v21 = vmul.f32 0.0625, %v84_v38  ;;  %v234_v36 = vmul.f32 %v1243_v34, %v1243_v34 }
  0xc4   :  { %v1251_v47 = vsub.f32 %v1084_v40, %v185_v5  ;;  %v326_v37 = vsel %vm66_vm0, %v250_v20, 0.0  ;;  %v1255_v50 = vsub.f32 %v1086_v41, %v169_v21  ;;  %v278_v8 = vsel %vm66_vm0, %v234_v36, 0.0 }
  0xc5   :  { %327 = vadd.xlane.f32.xlu0 %v326_v37  ;;  %v129_v51 = vpop.xlane.xlu0 %128  ;;  %282 = vadd.xlane.f32.xlu1 %v281_v39  ;;  %v81_v54 = vpop.xlane.xlu1 %80 }
  0xc6   :  { %v184_v9 = vmul.f32 0.0625, %v129_v51  ;;  %v249_v24 = vmul.f32 %v1251_v47, %v1251_v47  ;;  %v168_v25 = vmul.f32 0.0625, %v81_v54  ;;  %v233_v40 = vmul.f32 %v1255_v50, %v1255_v50 }
  0xc8   :  { %v1263_v63 = vsub.f32 %v1092_v44, %v184_v9  ;;  %v323_v41 = vsel %vm66_vm0, %v249_v24, 0.0  ;;  %v1267_v3 = vsub.f32 %v1094_v45, %v168_v25  ;;  %v275_v12 = vsel %vm66_vm0, %v233_v40, 0.0 }
  0xc9   :  { %324 = vadd.xlane.f32.xlu0 %v323_v41  ;;  %v126_v4 = vpop.xlane.xlu0 %125  ;;  %279 = vadd.xlane.f32.xlu1 %v278_v8  ;;  %v78_v6 = vpop.xlane.xlu1 %77 }
  0xca   :  { %v183_v13 = vmul.f32 0.0625, %v126_v4  ;;  %v248_v28 = vmul.f32 %v1263_v63, %v1263_v63  ;;  %v167_v29 = vmul.f32 0.0625, %v78_v6  ;;  %v232_v44 = vmul.f32 %v1267_v3, %v1267_v3 }
  0xcc   :  { %v1275_v19 = vsub.f32 %v1100_v48, %v183_v13  ;;  %v320_v45 = vsel %vm66_vm0, %v248_v28, 0.0  ;;  %v1279_v22 = vsub.f32 %v1102_v49, %v167_v29  ;;  %v272_v16 = vsel %vm66_vm0, %v232_v44, 0.0  ;;  %v561_v44 = vld [vmem:[%s1476_s3 + $0x8] sm:$0xff] }
  0xcd   :  { %321 = vadd.xlane.f32.xlu0 %v320_v45  ;;  %v123_v23 = vpop.xlane.xlu0 %122  ;;  %276 = vadd.xlane.f32.xlu1 %v275_v12  ;;  %v75_v27 = vpop.xlane.xlu1 %74 }
  0xce   :  { %v182_v17 = vmul.f32 0.0625, %v123_v23  ;;  %v247_v32 = vmul.f32 %v1275_v19, %v1275_v19  ;;  %v166_v33 = vmul.f32 0.0625, %v75_v27  ;;  %v231_v48 = vmul.f32 %v1279_v22, %v1279_v22 }
  0xd0   :  { %v1287_v35 = vsub.f32 %v1108_v52, %v182_v17  ;;  %v317_v49 = vsel %vm66_vm0, %v247_v32, 0.0  ;;  %v1291_v38 = vsub.f32 %v1110_v53, %v166_v33  ;;  %v269_v20 = vsel %vm66_vm0, %v231_v48, 0.0 }
  0xd1   :  { %318 = vadd.xlane.f32.xlu0 %v317_v49  ;;  %v120_v39 = vpop.xlane.xlu0 %119  ;;  %273 = vadd.xlane.f32.xlu1 %v272_v16  ;;  %v72_v5 = vpop.xlane.xlu1 %71 }
  0xd2   :  { %v181_v21 = vmul.f32 0.0625, %v120_v39  ;;  %v246_v36 = vmul.f32 %v1287_v35, %v1287_v35  ;;  %v165_v37 = vmul.f32 0.0625, %v72_v5  ;;  %v230_v52 = vmul.f32 %v1291_v38, %v1291_v38 }
  0xd4   :  { %v1299_v51 = vsub.f32 %v1116_v56, %v181_v21  ;;  %v314_v53 = vsel %vm66_vm0, %v246_v36, 0.0  ;;  %v1303_v54 = vsub.f32 %v1118_v57, %v165_v37  ;;  %v266_v9 = vsel %vm66_vm0, %v230_v52, 0.0 }
  0xd5   :  { %315 = vadd.xlane.f32.xlu0 %v314_v53  ;;  %v117_v8 = vpop.xlane.xlu0 %116  ;;  %270 = vadd.xlane.f32.xlu1 %v269_v20  ;;  %v69_v24 = vpop.xlane.xlu1 %68 }
  0xd6   :  { %v180_v25 = vmul.f32 0.0625, %v117_v8  ;;  %v245_v40 = vmul.f32 %v1299_v51, %v1299_v51  ;;  %v164_v41 = vmul.f32 0.0625, %v69_v24  ;;  %v229_v56 = vmul.f32 %v1303_v54, %v1303_v54 }
  0xd8   :  { %v1311_v4 = vsub.f32 %v1124_v60, %v180_v25  ;;  %v311_v57 = vsel %vm66_vm0, %v245_v40, 0.0  ;;  %v1315_v6 = vsub.f32 %v1126_v61, %v164_v41  ;;  %v263_v13 = vsel %vm66_vm0, %v229_v56, 0.0  ;;  %v560_v61 = vld [vmem:[%s1476_s3] sm:$0xff] }
  0xd9   :  { %312 = vadd.xlane.f32.xlu0 %v311_v57  ;;  %267 = vadd.xlane.f32.xlu1 %v266_v9 }
  0xda   :  { %v244_v12 = vmul.f32 %v1311_v4, %v1311_v4  ;;  %v228_v28 = vmul.f32 %v1315_v6, %v1315_v6 }
  0xdc   :  { %v308_v29 = vsel %vm66_vm0, %v244_v12, 0.0  ;;  %v260_v60 = vsel %vm66_vm0, %v228_v28, 0.0 }
  0xdd   :  { %309 = vadd.xlane.f32.xlu0 %v308_v29  ;;  %264 = vadd.xlane.f32.xlu1 %v263_v13  ;;  %v1333_v13 = vld [vmem:[%s1474_s1] ss:$0 sm:$0xff]  ;;  %s975_s1 = smov [#allocation5]  }
  0xe1   :  { %261 = vadd.xlane.f32.xlu1 %v260_v60 }
 0x10a   :  { %562 = vxpose.xlu0.b32.start [1/2] (short) (narrow) %v560_v61, 8 }
 0x10e   :  { %563 = vxpose.xlu0.b32.end [2/2] (short) (narrow) %v561_v44, 8 }
 0x12a   :  { %v355_v45 = vpop.xlane.xlu0 %354 }
 0x12b   :  { %v387_v23 = vmul.f32 0.0625, %v355_v45  ;;  %v1339_v45 = vld [vmem:[%s1475_s2] ss:$0 sm:$0xff]  ;;  %s779_s2 = sshll.u32 %s975_s1, 4  ;;  %s780_s2 = int_to_ptr.vmem [resolvable:$true] %s779_s2 }
 0x12c   :  { %s948_s28 = scalar_lea.vmem %s780_s2, 128  ;;  %p953_p6 = scmp.lt.s32.totalorder %s780_s2, %s780_s2 }
 0x12d   :  { %v419_v27 = vadd.f32 1e-05, %v387_v23  ;;  %p949_p5 = scmp.ne.s32.totalorder %s780_s2, %s948_s28  ;;  %p954_p7 = scmp.lt.s32.totalorder %s948_s28, %s948_s28 }
 0x12e   :  { %v352_v16 = vpop.xlane.xlu0 %351  ;;  %v307_v17 = vpop.xlane.xlu1 %306 }
 0x12f   :  { %864 = vrsqrt.f32 %v419_v27  ;;  %v386_v32 = vmul.f32 0.0625, %v352_v16  ;;  %v371_v33 = vmul.f32 0.0625, %v307_v17  ;;  %p955_p8 = por %p954_p7, %p953_p6 }
 0x131   :  { %v418_v48 = vadd.f32 1e-05, %v386_v32  ;;  %v403_v49 = vadd.f32 1e-05, %v371_v33  ;;  %p956_p9 = pnand %p955_p8, %p949_p5 }
 0x132   :  { %v349_v39 = vpop.xlane.xlu0 %348  ;;  %v304_v5 = vpop.xlane.xlu1 %303 }
 0x133   :  { %866 = vrsqrt.f32 %v418_v48  ;;  %v385_v20 = vmul.f32 0.0625, %v349_v39  ;;  %v370_v21 = vmul.f32 0.0625, %v304_v5 }
 0x134   :  { %868 = vrsqrt.f32 %v403_v49 }
 0x135   :  { %v417_v36 = vadd.f32 1e-05, %v385_v20  ;;  %v402_v37 = vadd.f32 1e-05, %v370_v21 }
 0x136   :  { %v346_v52 = vpop.xlane.xlu0 %345  ;;  %v301_v53 = vpop.xlane.xlu1 %300 }
 0x137   :  { %870 = vrsqrt.f32 %v417_v36  ;;  %v384_v8 = vmul.f32 0.0625, %v346_v52  ;;  %v369_v9 = vmul.f32 0.0625, %v301_v53 }
 0x138   :  { %872 = vrsqrt.f32 %v402_v37 }
 0x139   :  { %v416_v24 = vadd.f32 1e-05, %v384_v8  ;;  %v401_v25 = vadd.f32 1e-05, %v369_v9 }
 0x13a   :  { %v343_v40 = vpop.xlane.xlu0 %342  ;;  %v298_v41 = vpop.xlane.xlu1 %297 }
 0x13b   :  { %874 = vrsqrt.f32 %v416_v24  ;;  %v383_v56 = vmul.f32 0.0625, %v343_v40  ;;  %v368_v57 = vmul.f32 0.0625, %v298_v41 }
 0x13c   :  { %v865_v12 = vpop.eup %864  ;;  %876 = vrsqrt.f32 %v401_v25 }
 0x13d   :  { %v415_v28 = vadd.f32 1e-05, %v383_v56  ;;  %v400_v29 = vadd.f32 1e-05, %v368_v57  ;;  %v483_v60 = vmul.f32 %v865_v12, %v1133_v10 }
 0x13e   :  { %v340_v61 = vpop.xlane.xlu0 %339  ;;  %v295_v44 = vpop.xlane.xlu1 %294 }
 0x13f   :  { %878 = vrsqrt.f32 %v415_v28  ;;  %v382_v23 = vmul.f32 0.0625, %v340_v61  ;;  %v367_v27 = vmul.f32 0.0625, %v295_v44  ;;  %v521_v16 = vmul.f32 %v1333_v13, %v483_v60 }
 0x140   :  { %v867_v17 = vpop.eup %866  ;;  %880 = vrsqrt.f32 %v400_v29 }
 0x141   :  { %v869_v32 = vpop.eup %868  ;;  %v414_v33 = vadd.f32 1e-05, %v382_v23  ;;  %v399_v48 = vadd.f32 1e-05, %v367_v27  ;;  %v559_v49 = vadd.f32 %v1339_v45, %v521_v16  ;;  %v482_v10 = vmul.f32 %v867_v17, %v1136_v11 }
 0x142   :  { %v337_v39 = vpop.xlane.xlu0 %336  ;;  %v292_v5 = vpop.xlane.xlu1 %291  ;;  %v467_v20 = vmul.f32 %v869_v32, %v1143_v26 }
 0x143   :  { %882 = vrsqrt.f32 %v414_v33  ;;  %v381_v21 = vmul.f32 0.0625, %v337_v39  ;;  %v366_v36 = vmul.f32 0.0625, %v292_v5  ;;  %825 = vmatprep.subr.msk.mxu0 %vm66_vm0, %v559_v49  ;;  %v520_v37 = vmul.f32 %v1333_v13, %v482_v10 }
 0x144   :  { %v871_v52 = vpop.eup %870  ;;  %884 = vrsqrt.f32 %v399_v48  ;;  %v505_v53 = vmul.f32 %v1333_v13, %v467_v20 }
 0x145   :  { %v873_v8 = vpop.eup %872  ;;  %v413_v9 = vadd.f32 1e-05, %v381_v21  ;;  %v398_v24 = vadd.f32 1e-05, %v366_v36  ;;  %v558_v11 = vadd.f32 %v1339_v45, %v520_v37  ;;  %v481_v25 = vmul.f32 %v871_v52, %v1155_v2 }
 0x146   :  { %v334_v40 = vpop.xlane.xlu0 %333  ;;  %v289_v26 = vpop.xlane.xlu1 %288  ;;  %v543_v41 = vadd.f32 %v1339_v45, %v505_v53  ;;  %v466_v56 = vmul.f32 %v873_v8, %v1147_v0 }
 0x147   :  { %886 = vrsqrt.f32 %v413_v9  ;;  %v380_v57 = vmul.f32 0.0625, %v334_v40  ;;  %v365_v12 = vmul.f32 0.0625, %v289_v26  ;;  %v519_v28 = vmul.f32 %v1333_v13, %v481_v25 }
 0x148   :  { %v875_v29 = vpop.eup %874  ;;  %888 = vrsqrt.f32 %v398_v24  ;;  %826 = vmatpush3.xpose.msk.msra.mxu0 %vm66_vm0, %v543_v41  ;;  %v504_v60 = vmul.f32 %v1333_v13, %v466_v56 }
 0x149   :  { %v877_v61 = vpop.eup %876  ;;  %v412_v44 = vadd.f32 1e-05, %v380_v57  ;;  %v397_v2 = vadd.f32 1e-05, %v365_v12  ;;  %827 = vmatprep.subr.msk.mxu0 %vm66_vm0, %v558_v11  ;;  %v557_v23 = vadd.f32 %v1339_v45, %v519_v28  ;;  %v480_v0 = vmul.f32 %v875_v29, %v1167_v55 }
 0x14a   :  { %v331_v27 = vpop.xlane.xlu0 %330  ;;  %v286_v16 = vpop.xlane.xlu1 %285  ;;  %v542_v17 = vadd.f32 %v1339_v45, %v504_v60  ;;  %v465_v32 = vmul.f32 %v877_v61, %v1158_v42 }
 0x14b   :  { %890 = vrsqrt.f32 %v412_v44  ;;  %v379_v33 = vmul.f32 0.0625, %v331_v27  ;;  %v364_v48 = vmul.f32 0.0625, %v286_v16  ;;  %v518_v49 = vmul.f32 %v1333_v13, %v480_v0 }
 0x14c   :  { %v879_v10 = vpop.eup %878  ;;  %892 = vrsqrt.f32 %v397_v2  ;;  %828 = vmatpush3.xpose.msk.msra.mxu0 %vm66_vm0, %v542_v17  ;;  %v503_v39 = vmul.f32 %v1333_v13, %v465_v32 }
 0x14d   :  { %v881_v5 = vpop.eup %880  ;;  %v411_v20 = vadd.f32 1e-05, %v379_v33  ;;  %v396_v55 = vadd.f32 1e-05, %v364_v48  ;;  %829 = vmatprep.subr.msk.mxu0 %vm66_vm0, %v557_v23  ;;  %v556_v21 = vadd.f32 %v1339_v45, %v518_v49  ;;  %v479_v42 = vmul.f32 %v879_v10, %v1179_v7 }
 0x14e   :  { %v328_v36 = vpop.xlane.xlu0 %327  ;;  %v283_v37 = vpop.xlane.xlu1 %282  ;;  %v541_v52 = vadd.f32 %v1339_v45, %v503_v39  ;;  %v464_v53 = vmul.f32 %v881_v5, %v1171_v58 }
 0x14f   :  { %894 = vrsqrt.f32 %v411_v20  ;;  %v378_v8 = vmul.f32 0.0625, %v328_v36  ;;  %v363_v9 = vmul.f32 0.0625, %v283_v37  ;;  %v517_v24 = vmul.f32 %v1333_v13, %v479_v42 }
 0x150   :  { %v883_v11 = vpop.eup %882  ;;  %896 = vrsqrt.f32 %v396_v55  ;;  %830 = vmatpush3.xpose.msk.msra.mxu0 %vm66_vm0, %v541_v52  ;;  %v502_v25 = vmul.f32 %v1333_v13, %v464_v53 }
 0x151   :  { %v885_v40 = vpop.eup %884  ;;  %v410_v26 = vadd.f32 1e-05, %v378_v8  ;;  %v395_v7 = vadd.f32 1e-05, %v363_v9  ;;  %831 = vmatprep.subr.msk.mxu0 %vm66_vm0, %v556_v21  ;;  %v555_v41 = vadd.f32 %v1339_v45, %v517_v24  ;;  %v478_v58 = vmul.f32 %v883_v11, %v1191_v1 }
 0x152   :  { %v325_v56 = vpop.xlane.xlu0 %324  ;;  %v280_v57 = vpop.xlane.xlu1 %279  ;;  %v540_v12 = vadd.f32 %v1339_v45, %v502_v25  ;;  %v463_v28 = vmul.f32 %v885_v40, %v1183_v14 }
 0x153   :  { %898 = vrsqrt.f32 %v410_v26  ;;  %v377_v29 = vmul.f32 0.0625, %v325_v56  ;;  %v362_v60 = vmul.f32 0.0625, %v280_v57  ;;  %v516_v61 = vmul.f32 %v1333_v13, %v478_v58 }
 0x154   :  { %v887_v44 = vpop.eup %886  ;;  %900 = vrsqrt.f32 %v395_v7  ;;  %832 = vmatpush3.xpose.msk.msra.mxu0 %vm66_vm0, %v540_v12  ;;  %v501_v2 = vmul.f32 %v1333_v13, %v463_v28 }
 0x155   :  { %v889_v23 = vpop.eup %888  ;;  %v409_v0 = vadd.f32 1e-05, %v377_v29  ;;  %v394_v1 = vadd.f32 1e-05, %v362_v60  ;;  %833 = vmatprep.subr.msk.mxu0 %vm66_vm0, %v555_v41  ;;  %v554_v27 = vadd.f32 %v1339_v45, %v516_v61  ;;  %v477_v14 = vmul.f32 %v887_v44, %v1203_v43 }
 0x156   :  { %v322_v16 = vpop.xlane.xlu0 %321  ;;  %v277_v17 = vpop.xlane.xlu1 %276  ;;  %v539_v32 = vadd.f32 %v1339_v45, %v501_v2  ;;  %v462_v33 = vmul.f32 %v889_v23, %v1195_v30 }
 0x157   :  { %902 = vrsqrt.f32 %v409_v0  ;;  %v376_v48 = vmul.f32 0.0625, %v322_v16  ;;  %v361_v49 = vmul.f32 0.0625, %v277_v17  ;;  %v515_v10 = vmul.f32 %v1333_v13, %v477_v14 }
 0x158   :  { %v891_v39 = vpop.eup %890  ;;  %904 = vrsqrt.f32 %v394_v1  ;;  %834 = vmatpush3.xpose.msk.msra.mxu0 %vm66_vm0, %v539_v32  ;;  %v500_v5 = vmul.f32 %v1333_v13, %v462_v33 }
 0x159   :  { %v893_v20 = vpop.eup %892  ;;  %v408_v55 = vadd.f32 1e-05, %v376_v48  ;;  %v393_v43 = vadd.f32 1e-05, %v361_v49  ;;  %835 = vmatprep.subr.msk.mxu0 %vm66_vm0, %v554_v27  ;;  %v553_v21 = vadd.f32 %v1339_v45, %v515_v10  ;;  %v476_v30 = vmul.f32 %v891_v39, %v1215_v59 }
 0x15a   :  { %v319_v42 = vpop.xlane.xlu0 %318  ;;  %v274_v36 = vpop.xlane.xlu1 %273  ;;  %v538_v37 = vadd.f32 %v1339_v45, %v500_v5  ;;  %v461_v52 = vmul.f32 %v893_v20, %v1207_v46 }
 0x15b   :  { %906 = vrsqrt.f32 %v408_v55  ;;  %v375_v53 = vmul.f32 0.0625, %v319_v42  ;;  %v360_v8 = vmul.f32 0.0625, %v274_v36  ;;  %v514_v9 = vmul.f32 %v1333_v13, %v476_v30 }
 0x15c   :  { %v895_v24 = vpop.eup %894  ;;  %908 = vrsqrt.f32 %v393_v43  ;;  %836 = vmatpush3.xpose.msk.msra.mxu0 %vm66_vm0, %v538_v37  ;;  %v499_v11 = vmul.f32 %v1333_v13, %v461_v52 }
 0x15d   :  { %v897_v25 = vpop.eup %896  ;;  %v407_v40 = vadd.f32 1e-05, %v375_v53  ;;  %v392_v59 = vadd.f32 1e-05, %v360_v8  ;;  %837 = vmatprep.subr.msk.mxu0 %vm66_vm0, %v553_v21  ;;  %v552_v26 = vadd.f32 %v1339_v45, %v514_v9  ;;  %v475_v46 = vmul.f32 %v895_v24, %v1227_v15 }
 0x15e   :  { %v316_v7 = vpop.xlane.xlu0 %315  ;;  %v271_v41 = vpop.xlane.xlu1 %270  ;;  %v537_v58 = vadd.f32 %v1339_v45, %v499_v11  ;;  %v460_v56 = vmul.f32 %v897_v25, %v1219_v62 }
 0x15f   :  { %910 = vrsqrt.f32 %v407_v40  ;;  %v374_v57 = vmul.f32 0.0625, %v316_v7  ;;  %v359_v12 = vmul.f32 0.0625, %v271_v41  ;;  %v513_v28 = vmul.f32 %v1333_v13, %v475_v46 }
 0x160   :  { %v899_v29 = vpop.eup %898  ;;  %912 = vrsqrt.f32 %v392_v59  ;;  %838 = vmatpush3.xpose.msk.msra.mxu0 %vm66_vm0, %v537_v58  ;;  %v498_v60 = vmul.f32 %v1333_v13, %v460_v56 }
 0x161   :  { %v901_v61 = vpop.eup %900  ;;  %v406_v44 = vadd.f32 1e-05, %v374_v57  ;;  %v391_v15 = vadd.f32 1e-05, %v359_v12  ;;  %839 = vmatprep.subr.msk.mxu0 %vm66_vm0, %v552_v26  ;;  %v551_v2 = vadd.f32 %v1339_v45, %v513_v28  ;;  %v474_v62 = vmul.f32 %v899_v29, %v1239_v31 }
 0x162   :  { %v313_v23 = vpop.xlane.xlu0 %312  ;;  %v268_v0 = vpop.xlane.xlu1 %267  ;;  %v536_v1 = vadd.f32 %v1339_v45, %v498_v60  ;;  %v459_v27 = vmul.f32 %v901_v61, %v1231_v18 }
 0x163   :  { %914 = vrsqrt.f32 %v406_v44  ;;  %v373_v14 = vmul.f32 0.0625, %v313_v23  ;;  %v358_v16 = vmul.f32 0.0625, %v268_v0  ;;  %v512_v17 = vmul.f32 %v1333_v13, %v474_v62 }
 0x164   :  { %v903_v32 = vpop.eup %902  ;;  %916 = vrsqrt.f32 %v391_v15  ;;  %840 = vmatpush3.xpose.msk.msra.mxu0 %vm66_vm0, %v536_v1  ;;  %v497_v33 = vmul.f32 %v1333_v13, %v459_v27 }
 0x165   :  { %v905_v48 = vpop.eup %904  ;;  %v405_v49 = vadd.f32 1e-05, %v373_v14  ;;  %v390_v31 = vadd.f32 1e-05, %v358_v16  ;;  %841 = vmatprep.subr.msk.mxu0 %vm66_vm0, %v551_v2  ;;  %v550_v10 = vadd.f32 %v1339_v45, %v512_v17  ;;  %v473_v18 = vmul.f32 %v903_v32, %v1251_v47 }
 0x166   :  { %v310_v39 = vpop.xlane.xlu0 %309  ;;  %v265_v5 = vpop.xlane.xlu1 %264  ;;  %v535_v20 = vadd.f32 %v1339_v45, %v497_v33  ;;  %v458_v55 = vmul.f32 %v905_v48, %v1243_v34 }
 0x167   :  { %918 = vrsqrt.f32 %v405_v49  ;;  %v372_v43 = vmul.f32 0.0625, %v310_v39  ;;  %v357_v21 = vmul.f32 0.0625, %v265_v5  ;;  %v511_v30 = vmul.f32 %v1333_v13, %v473_v18 }
 0x168   :  { %v907_v42 = vpop.eup %906  ;;  %920 = vrsqrt.f32 %v390_v31  ;;  %842 = vmatpush3.xpose.msk.msra.mxu0 %vm66_vm0, %v535_v20  ;;  %v496_v36 = vmul.f32 %v1333_v13, %v458_v55 }
 0x169   :  { %v909_v37 = vpop.eup %908  ;;  %v404_v52 = vadd.f32 1e-05, %v372_v43  ;;  %v389_v47 = vadd.f32 1e-05, %v357_v21  ;;  %843 = vmatprep.subr.msk.mxu0 %vm66_vm0, %v550_v10  ;;  %v549_v53 = vadd.f32 %v1339_v45, %v511_v30  ;;  %v472_v34 = vmul.f32 %v907_v42, %v1263_v63 }
 0x16a   :  { %v262_v8 = vpop.xlane.xlu1 %261  ;;  %v534_v9 = vadd.f32 %v1339_v45, %v496_v36  ;;  %v457_v24 = vmul.f32 %v909_v37, %v1255_v50 }
 0x16b   :  { %922 = vrsqrt.f32 %v404_v52  ;;  %v356_v11 = vmul.f32 0.0625, %v262_v8  ;;  %v510_v25 = vmul.f32 %v1333_v13, %v472_v34 }
 0x16c   :  { %v911_v40 = vpop.eup %910  ;;  %924 = vrsqrt.f32 %v389_v47  ;;  %844 = vmatpush3.xpose.msk.msra.mxu0 %vm66_vm0, %v534_v9  ;;  %v495_v59 = vmul.f32 %v1333_v13, %v457_v24 }
 0x16d   :  { %v913_v26 = vpop.eup %912  ;;  %v388_v46 = vadd.f32 1e-05, %v356_v11  ;;  %845 = vmatprep.subr.msk.mxu0 %vm66_vm0, %v549_v53  ;;  %v548_v63 = vadd.f32 %v1339_v45, %v510_v25  ;;  %v471_v7 = vmul.f32 %v911_v40, %v1275_v19 }
 0x16e   :  { %v533_v50 = vadd.f32 %v1339_v45, %v495_v59  ;;  %v456_v41 = vmul.f32 %v913_v26, %v1267_v3 }
 0x16f   :  { %926 = vrsqrt.f32 %v388_v46  ;;  %v509_v58 = vmul.f32 %v1333_v13, %v471_v7 }
 0x170   :  { %v915_v56 = vpop.eup %914  ;;  %846 = vmatpush3.xpose.msk.msra.mxu0 %vm66_vm0, %v533_v50  ;;  %v494_v57 = vmul.f32 %v1333_v13, %v456_v41 }
 0x171   :  { %v917_v12 = vpop.eup %916  ;;  %847 = vmatprep.subr.msk.mxu0 %vm66_vm0, %v548_v63  ;;  %v547_v28 = vadd.f32 %v1339_v45, %v509_v58  ;;  %v470_v29 = vmul.f32 %v915_v56, %v1287_v35 }
 0x172   :  { %v532_v19 = vadd.f32 %v1339_v45, %v494_v57  ;;  %v455_v60 = vmul.f32 %v917_v12, %v1279_v22 }
 0x173   :  { %v508_v3 = vmul.f32 %v1333_v13, %v470_v29 }
 0x174   :  { %v919_v61 = vpop.eup %918  ;;  %848 = vmatpush3.xpose.msk.msra.mxu0 %vm66_vm0, %v532_v19  ;;  %v493_v44 = vmul.f32 %v1333_v13, %v455_v60 }
 0x175   :  { %v921_v15 = vpop.eup %920  ;;  %849 = vmatprep.subr.msk.mxu0 %vm66_vm0, %v547_v28  ;;  %v546_v2 = vadd.f32 %v1339_v45, %v508_v3  ;;  %v469_v62 = vmul.f32 %v919_v61, %v1299_v51 }
 0x176   :  { %v531_v35 = vadd.f32 %v1339_v45, %v493_v44  ;;  %v454_v23 = vmul.f32 %v921_v15, %v1291_v38 }
 0x177   :  { %v507_v22 = vmul.f32 %v1333_v13, %v469_v62 }
 0x178   :  { %v923_v0 = vpop.eup %922  ;;  %850 = vmatpush3.xpose.msk.msra.mxu0 %vm66_vm0, %v531_v35  ;;  %v492_v1 = vmul.f32 %v1333_v13, %v454_v23 }
 0x179   :  { %v925_v27 = vpop.eup %924  ;;  %851 = vmatprep.subr.msk.mxu0 %vm66_vm0, %v546_v2  ;;  %v545_v14 = vadd.f32 %v1339_v45, %v507_v22  ;;  %v468_v16 = vmul.f32 %v923_v0, %v1311_v4 }
 0x17a   :  { %v530_v51 = vadd.f32 %v1339_v45, %v492_v1  ;;  %v453_v17 = vmul.f32 %v925_v27, %v1303_v54 }
 0x17b   :  { %v506_v38 = vmul.f32 %v1333_v13, %v468_v16 }
 0x17c   :  { %v927_v32 = vpop.eup %926  ;;  %852 = vmatpush3.xpose.msk.msra.mxu0 %vm66_vm0, %v530_v51  ;;  %v491_v33 = vmul.f32 %v1333_v13, %v453_v17 }
 0x17d   :  { %853 = vmatprep.subr.msk.mxu0 %vm66_vm0, %v545_v14  ;;  %v544_v48 = vadd.f32 %v1339_v45, %v506_v38  ;;  %v452_v49 = vmul.f32 %v927_v32, %v1315_v6 }
 0x17e   :  { %v529_v31 = vadd.f32 %v1339_v45, %v491_v33 }
 0x17f   :  { %v490_v4 = vmul.f32 %v1333_v13, %v452_v49 }
 0x180   :  { %854 = vmatpush3.xpose.msk.msra.mxu0 %vm66_vm0, %v529_v31 }
 0x181   :  { %855 = vmatprep.subr.msk.mxu0 %vm66_vm0, %v544_v48  ;;  %v528_v54 = vadd.f32 %v1339_v45, %v490_v4 }
 0x184   :  { %856 = vmatpush3.xpose.msk.msra.mxu0 %vm66_vm0, %v528_v54 }
 0x186   :  { %v578_v10 = vpop.trf.xlu0 }
 0x187   :  { %857 = vmatprep.mubr.msk.f32.mxu0 %vm66_vm0, %v578_v10 }
 0x188   :  { %858 = vmatmul.mubr.msk.f32.vlgmr.msra.gmra.mxu0 %vm66_vm0, %v578_v10 }
 0x248   :  { %v759_v18 = vpop.f32.mrf.mxu0 }
 0x24a   :  { %v761_v6 = vpop.f32.mrf.mxu0 }
 0x24b   :  { %v824_v39 = vpack.c.bf16 %v761_v6, %v759_v18 }
 0x24d   :  { %772 = vst [vmem:[#allocation5] sm:$0xff] %v824_v39 }
 0x24e   :  { %959 = shalt.err (!%p956_p9)
}
 0x24f   :  { %782 = dma.vmem_to_hbm [thread:$0]  %s780_s2, 128, %s1477_s4, [#allocation4]  }
 0x250   :  { %970 = dma.done.wait [#allocation4], 128  }
 0x251   :  { %971 = vsyncadd [#allocation4], 4294967168 }
 0x252   :  { %786 = vsyncpa [#allocation3], 1 }
 0x253   :  { %787 = vsyncpa [#allocation4], 1 }

</bundles_post_ra>
